<compile_context>
chip_gen: v7x
topology: tpu7x:2x2x1
jax: 0.10.0
libtpu: 0.0.40
codegen_flags: <defaults>
</compile_context>

<pallas_src>
import math

import jax
import jax.numpy as jnp
from jax.experimental import pallas as pl
from jax.experimental.pallas import tpu as pltpu


def quad_act_kernel(x_ref, a_ref, b_ref, o_ref):
    """o = (w2*x)^2 + w1*x  ==  x * (a*x + b)  with a = w2*w2, b = w1."""
    x = x_ref[...]          # (tm, Dl)
    a = a_ref[...]          # (1, Dl) -- broadcasts over rows (sublanes)
    b = b_ref[...]          # (1, Dl)
    o_ref[...] = x * (a * x + b)


def trainable_quadratic_activation(x, w2, w1, *, max_tile_bytes=4 << 20):
    """Applies the trainable quadratic activation elementwise.

    w2/w1 have shape (D,) where D == x.shape[-1]; they broadcast over the last
    axis of x (matching the PyTorch module's semantics).
    """
    orig_shape = x.shape
    D = orig_shape[-1]
    assert w2.shape == (D,) and w1.shape == (D,), "weights must match last axis"
    dtype = x.dtype  # keep input dtype end-to-end (bf16 stays bf16 on v6e/v7x)

    x2 = x.reshape(-1, D)
    M = x2.shape[0]

    # ---- lane-dense repack: fold `rep` consecutive rows into the lane axis so
    # the last dim becomes a multiple of 128. Rows are contiguous in memory, so
    # tiling the weights `rep` times preserves the per-last-axis broadcast.
    rep = 1
    if D % 128 != 0:
        r = 128 // math.gcd(D, 128)   # smallest r with (D*r) % 128 == 0
        if M % r == 0:
            rep = r
    Ml, Dl = M // rep, D * rep
    xl = x2.reshape(Ml, Dl)

    a = (w2 * w2).astype(dtype)       # fold the square into the tiny weight vec
    b = w1.astype(dtype)
    if rep > 1:
        a = jnp.tile(a, rep)
        b = jnp.tile(b, rep)
    a2 = a.reshape(1, Dl)
    b2 = b.reshape(1, Dl)

    # ---- row tiling: largest multiple-of-8 row tile within a conservative
    # per-buffer budget (double-buffered in + out stays well under the 16 MiB
    # v5e scoped-VMEM default and v7x's 64 MiB physical VMEM). Small inputs
    # collapse to a single grid step.
    bytes_per_row = Dl * jnp.dtype(dtype).itemsize
    if Ml % 8 == 0:
        tm = min(Ml, max(8, (max_tile_bytes // bytes_per_row) // 8 * 8))
        while Ml % tm != 0:
            tm -= 8
    else:
        tm = Ml                        # block == full array dim (legal, 1 step)
    grid = (Ml // tm,)

    out = pl.pallas_call(
        quad_act_kernel,
        out_shape=jax.ShapeDtypeStruct((Ml, Dl), dtype),
        grid_spec=pl.GridSpec(
            grid=grid,
            in_specs=[
                pl.BlockSpec((tm, Dl), lambda i: (i, 0)),
                pl.BlockSpec((1, Dl), lambda i: (0, 0)),   # stays VMEM-resident
                pl.BlockSpec((1, Dl), lambda i: (0, 0)),
            ],
            out_specs=pl.BlockSpec((tm, Dl), lambda i: (i, 0)),
        ),
        compiler_params=pltpu.CompilerParams(
            dimension_semantics=("parallel",),
        ),
    )(xl, a2, b2)

    return out.reshape(orig_shape)


if __name__ == "__main__":
    key = jax.random.PRNGKey(0)
    kx, k2, k1 = jax.random.split(key, 3)

    # Input consistent with the module usage: NCHW activations, last axis == D.
    B, C, H, W = 2, 4, 16, 16
    input_dimension = W
    x = jax.random.normal(kx, (B, C, H, W), dtype=jnp.float32)

    # Module default init is w2 = zeros, w1 = ones (identity map); use random
    # "trained" weights so the quadratic path is actually exercised.
    w2 = 0.5 * jax.random.normal(k2, (input_dimension,), dtype=jnp.float32)
    w1 = 1.0 + 0.1 * jax.random.normal(k1, (input_dimension,), dtype=jnp.float32)

    out = trainable_quadratic_activation(x, w2, w1)
    out = jax.block_until_ready(out)

    # Pure-JAX reference of the PyTorch forward: (w2*x)^2 + w1*x
    ref = jnp.square(w2 * x) + w1 * x
    assert out.shape == x.shape and out.dtype == x.dtype
    assert jnp.allclose(out, ref, atol=1e-6, rtol=1e-6)

    # TODO(synk): nn.Parameter training / autograd is outside this forward-only kernel.
    print("KERNEL_OK")
</pallas_src>

<mosaic_0001>
module attributes {stable_mosaic.version = 11 : i64} {
  func.func @quad_act_kernel(%arg0: i32, %arg1: memref<16x128xf32, #tpu.memory_space<vmem>>, %arg2: memref<1x128xf32, #tpu.memory_space<vmem>>, %arg3: memref<1x128xf32, #tpu.memory_space<vmem>>, %arg4: memref<16x128xf32, #tpu.memory_space<vmem>>) attributes {dimension_semantics = [#tpu.dimension_semantics<parallel>], iteration_bounds = array<i64: 1>, scalar_prefetch = 0 : i64, scratch_operands = 0 : i64, tpu.core_type = #tpu.core_type<tc>, window_params = [{transform_indices = @transform_0, window_bounds = array<i64: 16, 128>}, {pipeline_mode = #tpu.pipeline_mode<synchronous>, transform_indices = @transform_1, window_bounds = array<i64: 1, 128>}, {pipeline_mode = #tpu.pipeline_mode<synchronous>, transform_indices = @transform_2, window_bounds = array<i64: 1, 128>}, {transform_indices = @transform_3, window_bounds = array<i64: 16, 128>}]} {
    %c0 = arith.constant 0 : index
    %c0_0 = arith.constant 0 : index
    %0 = vector.load %arg1[%c0, %c0_0] : memref<16x128xf32, #tpu.memory_space<vmem>>, vector<16x128xf32>
    %c0_1 = arith.constant 0 : index
    %c0_2 = arith.constant 0 : index
    %1 = vector.load %arg2[%c0_1, %c0_2] : memref<1x128xf32, #tpu.memory_space<vmem>>, vector<1x128xf32>
    %c0_3 = arith.constant 0 : index
    %c0_4 = arith.constant 0 : index
    %2 = vector.load %arg3[%c0_3, %c0_4] : memref<1x128xf32, #tpu.memory_space<vmem>>, vector<1x128xf32>
    %3 = vector.broadcast %1 : vector<1x128xf32> to vector<16x128xf32>
    %4 = arith.mulf %3, %0 : vector<16x128xf32>
    %5 = vector.broadcast %2 : vector<1x128xf32> to vector<16x128xf32>
    %6 = arith.addf %4, %5 : vector<16x128xf32>
    %7 = arith.mulf %0, %6 : vector<16x128xf32>
    %c0_5 = arith.constant 0 : index
    %c0_6 = arith.constant 0 : index
    %8 = vector.load %arg4[%c0_5, %c0_6] : memref<16x128xf32, #tpu.memory_space<vmem>>, vector<16x128xf32>
    tpu.vector_store %arg4[%c0_5, %c0_6], %7 {strides = array<i32>} : memref<16x128xf32, #tpu.memory_space<vmem>>, vector<16x128xf32>,
    return
  }
  func.func @transform_0(%arg0: i32) -> (i32, i32) {
    %c0_i32 = arith.constant 0 : i32
    %c0_i32_0 = arith.constant 0 : i32
    return %arg0, %c0_i32 : i32, i32
  }
  func.func @transform_1(%arg0: i32) -> (i32, i32) {
    %c0_i32 = arith.constant 0 : i32
    %c0_i32_0 = arith.constant 0 : i32
    %c0_i32_1 = arith.constant 0 : i32
    return %c0_i32, %c0_i32_0 : i32, i32
  }
  func.func @transform_2(%arg0: i32) -> (i32, i32) {
    %c0_i32 = arith.constant 0 : i32
    %c0_i32_0 = arith.constant 0 : i32
    %c0_i32_1 = arith.constant 0 : i32
    return %c0_i32, %c0_i32_0 : i32, i32
  }
  func.func @transform_3(%arg0: i32) -> (i32, i32) {
    %c0_i32 = arith.constant 0 : i32
    %c0_i32_0 = arith.constant 0 : i32
    return %arg0, %c0_i32 : i32, i32
  }
}

</mosaic_0001>

<bundles_post_ra>
// kernel: tpu_custom_call.1
= control target key start
LH: loop header
LB: loop body
LE: loop exit
PB: predicated region body
PF: predicated region fallthrough
CT: control target
= control target key end

     0   :  { %8 = vsyncpa [#allocation3], 0  ;;  %s184_s0 = inlined_call_operand.hbm [shape: f32[16,128], index: 0, kind: input, shape index: {}]   ;;  %s185_s1 = inlined_call_operand.vmem [shape: f32[1,128], index: 1, kind: input, shape index: {}]   ;;  %s186_s2 = inlined_call_operand.vmem [shape: f32[1,128], index: 2, kind: input, shape index: {}]   ;;  %s187_s3 = inlined_call_operand.hbm [shape: f32[16,128], index: 3, kind: output, shape index: {}]  }
   0x1   :  { %9 = vsyncpa [#allocation4], 0  ;;  %s124_s12 = smov [#allocation2]   ;;  %s76_s16 = scalar_lea.hbm %s184_s0, 256 }
   0x2   :  { %s15_s13 = sshll.u32 %s124_s12, 4  ;;  %p77_p0 = scmp.ne.s32.totalorder %s184_s0, %s76_s16  ;;  %s16_s13 = int_to_ptr.vmem [resolvable:$true] %s15_s13 }
   0x3   :  { %p80_p1 = scmp.lt.u32.totalorder %s76_s16, %s184_s0 }
   0x5   :  { %p82_p2 = pnand %p80_p1, %p77_p0 }
   0x7   :  { %85 = shalt.err (!%p82_p2)
}
   0x8   :  { %s86_s21 = scalar_lea.vmem %s16_s13, 256  ;;  %p91_p4 = scmp.lt.s32.totalorder %s16_s13, %s16_s13 }
   0x9   :  { %p87_p3 = scmp.ne.s32.totalorder %s16_s13, %s86_s21  ;;  %p92_p5 = scmp.lt.s32.totalorder %s86_s21, %s86_s21 }
   0xb   :  { %p93_p6 = por %p92_p5, %p91_p4 }
   0xd   :  { %p94_p7 = pnand %p93_p6, %p87_p3 }
   0xf   :  { %97 = shalt.err (!%p94_p7)
}
  0x10   :  { %s125_s22 = smov 128   ;;  %s126_s23 = smov 8  }
  0x11   :  { %21 = dma.hbm_to_vmem [thread:$0]  %s184_s0, 256, %s16_s13, [#allocation3], %s125_s22, %s125_s22, %s126_s23  }
  0x12   :  { %120 = dma.done.wait [#allocation3], 256  }
  0x13   :  { %121 = vsyncadd [#allocation3], 4294967040  ;;  %v29_v0 = vld [vmem:[#allocation2] sm:$0xff]  ;;  %v30_v4 = vld [vmem:[#allocation2 + $0x8] sm:$0xff]  ;;  %s127_s30 = smov [#allocation5]  }
  0x14   :  { %v70_v1 = vld [vmem:[%s185_s1] ss:$0 sm:$0xff]  ;;  %s58_s4 = sshll.u32 %s127_s30, 4  ;;  %s59_s4 = int_to_ptr.vmem [resolvable:$true] %s58_s4 }
  0x15   :  { %v71_v2 = vld [vmem:[%s186_s2] ss:$0 sm:$0xff]  ;;  %v39_v3 = vmul.f32 %v70_v1, %v29_v0  ;;  %v40_v5 = vmul.f32 %v70_v1, %v30_v4  ;;  %s98_s0 = scalar_lea.vmem %s59_s4, 256  ;;  %p103_p9 = scmp.lt.s32.totalorder %s59_s4, %s59_s4 }
  0x16   :  { %p99_p8 = scmp.ne.s32.totalorder %s59_s4, %s98_s0  ;;  %p104_p10 = scmp.lt.s32.totalorder %s98_s0, %s98_s0 }
  0x17   :  { %v47_v6 = vadd.f32 %v71_v2, %v39_v3  ;;  %v48_v7 = vadd.f32 %v71_v2, %v40_v5 }
  0x18   :  { %p105_p11 = por %p104_p10, %p103_p9 }
  0x19   :  { %v49_v8 = vmul.f32 %v47_v6, %v29_v0  ;;  %v50_v9 = vmul.f32 %v48_v7, %v30_v4 }
  0x1a   :  { %p106_p12 = pnand %p105_p11, %p99_p8 }
  0x1b   :  { %51 = vst [vmem:[#allocation5] sm:$0xff] %v49_v8  ;;  %52 = vst [vmem:[#allocation5 + $0x8] sm:$0xff] %v50_v9 }
  0x1c   :  { %109 = shalt.err (!%p106_p12)
}
  0x1d   :  { %s110_s5 = scalar_lea.hbm %s187_s3, 256 }
  0x1e   :  { %p111_p13 = scmp.ne.s32.totalorder %s187_s3, %s110_s5  ;;  %p114_p0 = scmp.lt.u32.totalorder %s110_s5, %s187_s3 }
  0x20   :  { %p116_p1 = pnand %p114_p0, %p111_p13 }
  0x22   :  { %119 = shalt.err (!%p116_p1)
}
  0x23   :  { %64 = dma.vmem_to_hbm [thread:$0]  %s59_s4, 256, %s187_s3, [#allocation4], %s125_s22, %s125_s22, %s126_s23  }
  0x24   :  { %122 = dma.done.wait [#allocation4], 256  }
  0x25   :  { %123 = vsyncadd [#allocation4], 4294967040 }
  0x26   :  { %68 = vsyncpa [#allocation3], 1 }
  0x27   :  { %69 = vsyncpa [#allocation4], 1 }

</bundles_post_ra>
